<compile_context>
chip_gen: v5e
topology: v5e:2x2
jax: 0.10.0
libtpu: 0.0.40
codegen_flags: <defaults>
</compile_context>

<pallas_src>
import functools

import jax
import jax.numpy as jnp
from jax.experimental import pallas as pl
from jax.experimental.pallas import tpu as pltpu


# ----------------------------------------------------------------------------
# Fused Pallas kernel: aux_head linear + pearson fDAL divergence + stats
# ----------------------------------------------------------------------------
def _fdal_divergence_head_kernel(
    feat_ref,   # (2B, D)  bf16   -- [features_s ; features_t] stacked on rows
    w_ref,      # (D, Kout) bf16  -- aux_head weight
    b_ref,      # (1, Kout) f32   -- aux_head bias
    loss_ref,   # (1, 1) f32      -- reg_coef * fDAL loss
    src_ref,    # (1, 1) f32      -- internal_stats['lhatsrc']
    trg_ref,    # (1, 1) f32      -- internal_stats['lhattrg']
    dst_ref,    # (1, 1) f32      -- internal_stats['dst']
    *,
    n_src,
    gamma,
    multiplier,
    reg_coef,
):
    # WarmGRL forward is the identity (only the backward pass reverses grads).
    feat = feat_ref[...]
    w = w_ref[...]

    # Single shared-weight matmul for source and target rows; bf16 operands,
    # f32 accumulation on the MXU.
    v = jnp.dot(feat, w, preferred_element_type=jnp.float32)      # (2B, Kout) f32
    v = v + b_ref[...]                                            # bias broadcast

    v_s = v[:n_src, :]      # y_s_adv
    v_t = v[n_src:, :]      # y_t_adv

    # pearson divergence:  T(v) = v ,  f*(t) = 0.25 * t^2 + t
    lhatsrc = jnp.mean(v_s, keepdims=True)                         # (1, 1)
    lhattrg = jnp.mean(v_t, keepdims=True)                         # (1, 1)
    phistar_t = jnp.mean(0.25 * v_t * v_t + v_t, keepdims=True)    # (1, 1)

    dst = gamma * lhatsrc - phistar_t

    # Minimize -dst (the GRL handles the max over the aux head in backward).
    loss_ref[...] = reg_coef * (-multiplier * dst)
    src_ref[...] = lhatsrc
    trg_ref[...] = lhattrg
    dst_ref[...] = dst


def fdal_divergence_head_forward(
    params,
    features_s,
    features_t,
    pred_src,
    pred_trg,
    *,
    n_classes=-1,
    reg_coef=1.0,
    gamma=1.0,
):
    """fDALDivergenceHead.forward as one fused Pallas call.

    Returns (loss, internal_stats) -- the torch module returns the loss tensor
    and stores internal_stats on the instance; here stats are returned.
    """
    # TODO(synk): n_classes > 1 (class-conditional picking of v_s/v_t via
    #             argmax(pred) + nll gather) is not implemented; with the
    #             global-discriminator path (n_classes <= 1) pred_src/pred_trg
    #             are not consumed, exactly as in the torch code for K <= 1.
    assert n_classes <= 1, "only the global-discriminator path is implemented"
    del pred_src, pred_trg

    B = features_s.shape[0]

    # Stack source/target rows so the shared aux_head weight is used in a
    # single matmul; cast matmul operands to bf16 (f32 accumulation in-kernel).
    feat = jnp.concatenate(
        [features_s.reshape(B, -1), features_t.reshape(B, -1)], axis=0
    ).astype(jnp.bfloat16)                                  # (2B, D)
    w = params["W_aux"].astype(jnp.bfloat16)                # (D, Kout)
    b = params["b_aux"].reshape(1, -1).astype(jnp.float32)  # (1, Kout)

    vmem_spec = pl.BlockSpec(memory_space=pltpu.MemorySpace.VMEM)
    scalar_out = jax.ShapeDtypeStruct((1, 1), jnp.float32)

    loss, src, trg, dst = pl.pallas_call(
        functools.partial(
            _fdal_divergence_head_kernel,
            n_src=B,
            gamma=float(gamma),
            multiplier=1.0,
            reg_coef=float(reg_coef),
        ),
        out_shape=(scalar_out, scalar_out, scalar_out, scalar_out),
        in_specs=[vmem_spec, vmem_spec, vmem_spec],
        out_specs=(vmem_spec, vmem_spec, vmem_spec, vmem_spec),
    )(feat, w, b)

    total_loss = loss[0, 0]
    internal_stats = {
        "lhatsrc": src[0, 0],
        "lhattrg": trg[0, 0],
        "acc": jnp.float32(-1.0),   # domain_discriminator_accuracy placeholder
        "dst": dst[0, 0],
    }
    return total_loss, internal_stats


# ----------------------------------------------------------------------------
# Parameter setup (deterministic, synthetic aux_head = Linear(D -> Kout))
# ----------------------------------------------------------------------------
def init_params(key, D, Kout):
    kw, kb = jax.random.split(key, 2)
    s = 0.05
    return {
        "W_aux": s * jax.random.normal(kw, (D, Kout), jnp.float32),
        "b_aux": s * jax.random.normal(kb, (Kout,), jnp.float32),
    }


# ----------------------------------------------------------------------------
# Main
# ----------------------------------------------------------------------------
if __name__ == "__main__":
    key = jax.random.PRNGKey(0)
    k_fs, k_ft, k_ps, k_pt, k_p = jax.random.split(key, 5)

    B = 2
    C, H, W = 4, 16, 16
    D = C * H * W          # 1024-wide flattened backbone features
    KOUT = 8               # aux_head output width

    features_s = jax.random.normal(k_fs, (B, D), jnp.float32)
    features_t = jax.random.normal(k_ft, (B, D), jnp.float32)
    pred_src = jax.random.normal(k_ps, (B, KOUT), jnp.float32)   # unused (K<=1)
    pred_trg = jax.random.normal(k_pt, (B, KOUT), jnp.float32)   # unused (K<=1)

    params = init_params(k_p, D, KOUT)

    fwd = jax.jit(
        functools.partial(
            fdal_divergence_head_forward, n_classes=-1, reg_coef=1.0, gamma=1.0
        )
    )
    loss, stats = fwd(params, features_s, features_t, pred_src, pred_trg)
    jax.block_until_ready(loss)
    jax.block_until_ready(stats)

    print("KERNEL_OK")
</pallas_src>

<mosaic_0001>
module attributes {stable_mosaic.version = 11 : i64} {
  func.func @_fdal_divergence_head_kernel(%arg0: memref<4x1024xbf16, #tpu.memory_space<vmem>>, %arg1: memref<1024x8xbf16, #tpu.memory_space<vmem>>, %arg2: memref<1x8xf32, #tpu.memory_space<vmem>>, %arg3: memref<1x1xf32, #tpu.memory_space<vmem>>, %arg4: memref<1x1xf32, #tpu.memory_space<vmem>>, %arg5: memref<1x1xf32, #tpu.memory_space<vmem>>, %arg6: memref<1x1xf32, #tpu.memory_space<vmem>>) attributes {dimension_semantics = [], scalar_prefetch = 0 : i64, scratch_operands = 0 : i64, tpu.core_type = #tpu.core_type<tc>} {
    %c0 = arith.constant 0 : index
    %c0_0 = arith.constant 0 : index
    %0 = vector.load %arg0[%c0, %c0_0] : memref<4x1024xbf16, #tpu.memory_space<vmem>>, vector<4x1024xbf16>
    %c0_1 = arith.constant 0 : index
    %c0_2 = arith.constant 0 : index
    %1 = vector.load %arg1[%c0_1, %c0_2] : memref<1024x8xbf16, #tpu.memory_space<vmem>>, vector<1024x8xbf16>
    %cst = arith.constant dense<0.000000e+00> : vector<4x8xf32>
    %2 = tpu.matmul %0, %1, %cst {dimension_numbers = #tpu.dot_dimension_numbers<[1], [0], [0], [1], [0, 0, 1, 1], [], []>} : vector<4x1024xbf16>, vector<1024x8xbf16>, vector<4x8xf32> -> vector<4x8xf32>
    %c0_3 = arith.constant 0 : index
    %c0_4 = arith.constant 0 : index
    %3 = vector.load %arg2[%c0_3, %c0_4] : memref<1x8xf32, #tpu.memory_space<vmem>>, vector<1x8xf32>
    %4 = vector.broadcast %3 : vector<1x8xf32> to vector<4x8xf32>
    %5 = arith.addf %2, %4 : vector<4x8xf32>
    %6 = vector.extract_strided_slice %5 {offsets = [0, 0], sizes = [2, 8], strides = [1, 1]} : vector<4x8xf32> to vector<2x8xf32>
    %7 = vector.extract_strided_slice %5 {offsets = [2, 0], sizes = [2, 8], strides = [1, 1]} : vector<4x8xf32> to vector<2x8xf32>
    %8 = vector.shape_cast %6 : vector<2x8xf32> to vector<1x2x8xf32>
    %cst_5 = arith.constant dense<0.000000e+00> : vector<1xf32>
    %9 = vector.multi_reduction <add>, %8, %cst_5 [1, 2] : vector<1x2x8xf32> to vector<1xf32>
    %10 = vector.shape_cast %9 : vector<1xf32> to vector<1x1x1xf32>
    %11 = vector.extract %10[0, 0, 0] : f32 from vector<1x1x1xf32>
    %12 = vector.broadcast %11 : f32 to vector<1x1xf32>
    %cst_6 = arith.constant 1.600000e+01 : f32
    %13 = vector.broadcast %cst_6 : f32 to vector<1x1xf32>
    %14 = arith.divf %12, %13 : vector<1x1xf32>
    %15 = vector.shape_cast %7 : vector<2x8xf32> to vector<1x2x8xf32>
    %cst_7 = arith.constant dense<0.000000e+00> : vector<1xf32>
    %16 = vector.multi_reduction <add>, %15, %cst_7 [1, 2] : vector<1x2x8xf32> to vector<1xf32>
    %17 = vector.shape_cast %16 : vector<1xf32> to vector<1x1x1xf32>
    %18 = vector.extract %17[0, 0, 0] : f32 from vector<1x1x1xf32>
    %19 = vector.broadcast %18 : f32 to vector<1x1xf32>
    %cst_8 = arith.constant 1.600000e+01 : f32
    %20 = vector.broadcast %cst_8 : f32 to vector<1x1xf32>
    %21 = arith.divf %19, %20 : vector<1x1xf32>
    %cst_9 = arith.constant 2.500000e-01 : f32
    %22 = vector.broadcast %cst_9 : f32 to vector<2x8xf32>
    %23 = arith.mulf %22, %7 : vector<2x8xf32>
    %24 = arith.mulf %23, %7 : vector<2x8xf32>
    %25 = arith.addf %24, %7 : vector<2x8xf32>
    %26 = vector.shape_cast %25 : vector<2x8xf32> to vector<1x2x8xf32>
    %cst_10 = arith.constant dense<0.000000e+00> : vector<1xf32>
    %27 = vector.multi_reduction <add>, %26, %cst_10 [1, 2] : vector<1x2x8xf32> to vector<1xf32>
    %28 = vector.shape_cast %27 : vector<1xf32> to vector<1x1x1xf32>
    %29 = vector.extract %28[0, 0, 0] : f32 from vector<1x1x1xf32>
    %30 = vector.broadcast %29 : f32 to vector<1x1xf32>
    %cst_11 = arith.constant 1.600000e+01 : f32
    %31 = vector.broadcast %cst_11 : f32 to vector<1x1xf32>
    %32 = arith.divf %30, %31 : vector<1x1xf32>
    %cst_12 = arith.constant 1.000000e+00 : f32
    %33 = vector.broadcast %cst_12 : f32 to vector<1x1xf32>
    %34 = arith.mulf %33, %14 : vector<1x1xf32>
    %35 = arith.subf %34, %32 : vector<1x1xf32>
    %cst_13 = arith.constant -1.000000e+00 : f32
    %36 = vector.broadcast %cst_13 : f32 to vector<1x1xf32>
    %37 = arith.mulf %36, %35 : vector<1x1xf32>
    %cst_14 = arith.constant 1.000000e+00 : f32
    %38 = vector.broadcast %cst_14 : f32 to vector<1x1xf32>
    %39 = arith.mulf %38, %37 : vector<1x1xf32>
    %c0_15 = arith.constant 0 : index
    %c0_16 = arith.constant 0 : index
    %40 = vector.load %arg3[%c0_15, %c0_16] : memref<1x1xf32, #tpu.memory_space<vmem>>, vector<1x1xf32>
    tpu.vector_store %arg3[%c0_15, %c0_16], %39 {strides = array<i32>} : memref<1x1xf32, #tpu.memory_space<vmem>>, vector<1x1xf32>,
    %c0_17 = arith.constant 0 : index
    %c0_18 = arith.constant 0 : index
    %41 = vector.load %arg4[%c0_17, %c0_18] : memref<1x1xf32, #tpu.memory_space<vmem>>, vector<1x1xf32>
    tpu.vector_store %arg4[%c0_17, %c0_18], %14 {strides = array<i32>} : memref<1x1xf32, #tpu.memory_space<vmem>>, vector<1x1xf32>,
    %c0_19 = arith.constant 0 : index
    %c0_20 = arith.constant 0 : index
    %42 = vector.load %arg5[%c0_19, %c0_20] : memref<1x1xf32, #tpu.memory_space<vmem>>, vector<1x1xf32>
    tpu.vector_store %arg5[%c0_19, %c0_20], %21 {strides = array<i32>} : memref<1x1xf32, #tpu.memory_space<vmem>>, vector<1x1xf32>,
    %c0_21 = arith.constant 0 : index
    %c0_22 = arith.constant 0 : index
    %43 = vector.load %arg6[%c0_21, %c0_22] : memref<1x1xf32, #tpu.memory_space<vmem>>, vector<1x1xf32>
    tpu.vector_store %arg6[%c0_21, %c0_22], %35 {strides = array<i32>} : memref<1x1xf32, #tpu.memory_space<vmem>>, vector<1x1xf32>,
    return
  }
}

</mosaic_0001>

<bundles_post_ra>
// kernel: fdal_divergence_head_forward.1
= control target key start
LH: loop header
LB: loop body
LE: loop exit
PB: predicated region body
PF: predicated region fallthrough
CT: control target
= control target key end

     0   :  { %12 = vsyncpa [#allocation3], 0  ;;  %s1480_s0 = inlined_call_operand.vmem [shape: bf16[4,1024], index: 0, kind: input, shape index: {}]   ;;  %s1481_s1 = inlined_call_operand.vmem [shape: bf16[1024,8], index: 1, kind: input, shape index: {}]   ;;  %s1482_s2 = inlined_call_operand.vmem [shape: f32[1,8], index: 2, kind: input, shape index: {}]   ;;  %s1483_s3 = inlined_call_operand.hbm [shape: f32[1,1], index: 3, kind: output, shape index: {0}]   ;;  %s1484_s4 = inlined_call_operand.hbm [shape: f32[1,1], index: 4, kind: output, shape index: {1}]   ;;  %s1485_s5 = inlined_call_operand.hbm [shape: f32[1,1], index: 5, kind: output, shape index: {2}]   ;;  %s1486_s6 = inlined_call_operand.hbm [shape: f32[1,1], index: 6, kind: output, shape index: {3}]  }
   0x1   :  { %13 = vsyncpa [#allocation5], 0  ;;  %v1050_v0 = vld [vmem:[%s1481_s1 + $0x38] sm:$0xff]  ;;  %v1049_v4 = vld [vmem:[%s1481_s1 + $0x30] sm:$0xff] }
   0x2   :  { %v1058_v1 = vld [vmem:[%s1481_s1 + $0x78] sm:$0xff]  ;;  %560 = vmatpush.bf16.msra.mxu0 %v1050_v0  ;;  %v1057_v5 = vld [vmem:[%s1481_s1 + $0x70] sm:$0xff]  ;;  %v1048_v8 = vld [vmem:[%s1481_s1 + $0x28] sm:$0xff] }
   0x3   :  { %v1066_v2 = vld [vmem:[%s1481_s1 + $0xb8] sm:$0xff]  ;;  %573 = vmatpush.bf16.msra.mxu1 %v1058_v1  ;;  %v1065_v6 = vld [vmem:[%s1481_s1 + $0xb0] sm:$0xff]  ;;  %v1056_v9 = vld [vmem:[%s1481_s1 + $0x68] sm:$0xff] }
   0x4   :  { %v1074_v3 = vld [vmem:[%s1481_s1 + $0xf8] sm:$0xff]  ;;  %586 = vmatpush.bf16.msra.mxu2 %v1066_v2  ;;  %v1073_v7 = vld [vmem:[%s1481_s1 + $0xf0] sm:$0xff]  ;;  %v1064_v10 = vld [vmem:[%s1481_s1 + $0xa8] sm:$0xff] }
   0x5   :  { %599 = vmatpush.bf16.msra.mxu3 %v1074_v3  ;;  %v1072_v11 = vld [vmem:[%s1481_s1 + $0xe8] sm:$0xff]  ;;  %v1047_v12 = vld [vmem:[%s1481_s1 + $0x20] sm:$0xff]  ;;  %v1046_v17 = vld [vmem:[%s1481_s1 + $0x18] sm:$0xff] }
   0x6   :  { %561 = vmatpush.bf16.msra.mxu0 %v1049_v4  ;;  %v1055_v13 = vld [vmem:[%s1481_s1 + $0x60] sm:$0xff]  ;;  %v1054_v18 = vld [vmem:[%s1481_s1 + $0x58] sm:$0xff]  ;;  %v1045_v21 = vld [vmem:[%s1481_s1 + $0x10] sm:$0xff] }
   0x7   :  { %574 = vmatpush.bf16.msra.mxu1 %v1057_v5  ;;  %v1063_v14 = vld [vmem:[%s1481_s1 + $0xa0] sm:$0xff]  ;;  %v1062_v19 = vld [vmem:[%s1481_s1 + $0x98] sm:$0xff]  ;;  %v1053_v22 = vld [vmem:[%s1481_s1 + $0x50] sm:$0xff] }
   0x8   :  { %587 = vmatpush.bf16.msra.mxu2 %v1065_v6  ;;  %v1071_v15 = vld [vmem:[%s1481_s1 + $0xe0] sm:$0xff]  ;;  %v1070_v20 = vld [vmem:[%s1481_s1 + $0xd8] sm:$0xff] }
   0x9   :  { %600 = vmatpush.bf16.msra.mxu3 %v1073_v7  ;;  %v21_v16 = vld [vmem:[%s1480_s0] sm:$0xff] }
   0xa   :  { %562 = vmatpush.bf16.msra.mxu0 %v1048_v8  ;;  %156 = vst [vmem:[#allocation1] ss:$4 sm:$0xff] %v21_v16 }
   0xb   :  { %575 = vmatpush.bf16.msra.mxu1 %v1056_v9 }
   0xc   :  { %588 = vmatpush.bf16.msra.mxu2 %v1064_v10 }
   0xd   :  { %601 = vmatpush.bf16.msra.mxu3 %v1072_v11 }
   0xe   :  { %563 = vmatpush.bf16.msra.mxu0 %v1047_v12 }
   0xf   :  { %576 = vmatpush.bf16.msra.mxu1 %v1055_v13 }
  0x10   :  { %589 = vmatpush.bf16.msra.mxu2 %v1063_v14 }
  0x11   :  { %602 = vmatpush.bf16.msra.mxu3 %v1071_v15 }
  0x12   :  { %564 = vmatpush.bf16.msra.mxu0 %v1046_v17 }
  0x13   :  { %577 = vmatpush.bf16.msra.mxu1 %v1054_v18 }
  0x14   :  { %14 = vsyncpa [#allocation8], 0  ;;  %590 = vmatpush.bf16.msra.mxu2 %v1062_v19  ;;  %v1061_v23 = vld [vmem:[%s1481_s1 + $0x90] sm:$0xff]  ;;  %v1044_v25 = vld [vmem:[%s1481_s1 + $0x8] sm:$0xff]  ;;  %vm664_vm0 = vcmask 58368   ;;  %s742_s10 = sshll.u32 %s1484_s4, 4  ;;  %s743_s10 = int_to_ptr.hbm [resolvable:$true] %s742_s10 }
  0x15   :  { %603 = vmatpush.bf16.msra.mxu3 %v1070_v20  ;;  %v1069_v24 = vld [vmem:[%s1481_s1 + $0xd0] sm:$0xff]  ;;  %v1052_v26 = vld [vmem:[%s1481_s1 + $0x48] sm:$0xff]  ;;  %v1043_v30 = vld [vmem:[%s1481_s1] sm:$0xff]  ;;  %vm719_vm2 = vcmask 0   ;;  %s1225_s12 = smov [#allocation6]   ;;  %s753_s16 = sshll.u32 %s1485_s5, 4  ;;  %s754_s16 = int_to_ptr.hbm [resolvable:$true] %s753_s16 }
  0x16   :  { %565 = vmatpush.bf16.msra.mxu0 %v1045_v21  ;;  %v1060_v27 = vld [vmem:[%s1481_s1 + $0x88] sm:$0xff]  ;;  %v1051_v31 = vld [vmem:[%s1481_s1 + $0x40] sm:$0xff]  ;;  %v1082_v34 = vld [vmem:[%s1481_s1 + $0x138] sm:$0xff]  ;;  %s751_s13 = sshll.u32 %s1225_s12, 4  ;;  %s1226_s17 = smov [#allocation7]   ;;  %s752_s13 = int_to_ptr.vmem [resolvable:$true] %s751_s13 }
  0x17   :  { %578 = vmatpush.bf16.msra.mxu1 %v1053_v22  ;;  %v1068_v28 = vld [vmem:[%s1481_s1 + $0xc8] sm:$0xff]  ;;  %v1059_v32 = vld [vmem:[%s1481_s1 + $0x80] sm:$0xff]  ;;  %v1090_v35 = vld [vmem:[%s1481_s1 + $0x178] sm:$0xff]  ;;  %s762_s18 = sshll.u32 %s1226_s17, 4  ;;  %s764_s21 = sshll.u32 %s1486_s6, 4  ;;  %s763_s18 = int_to_ptr.vmem [resolvable:$true] %s762_s18  ;;  %s765_s21 = int_to_ptr.hbm [resolvable:$true] %s764_s21 }
  0x18   :  { %591 = vmatpush.bf16.msra.mxu2 %v1061_v23  ;;  %v22_v29 = vld [vmem:[%s1480_s0 + $0x8] sm:$0xff]  ;;  %v1067_v33 = vld [vmem:[%s1481_s1 + $0xc0] sm:$0xff]  ;;  %v1098_v36 = vld [vmem:[%s1481_s1 + $0x1b8] sm:$0xff]  ;;  %s1227_s22 = smov [#allocation2]   ;;  %s731_s5 = sshll.u32 %s1483_s3, 4  ;;  %s732_s5 = int_to_ptr.hbm [resolvable:$true] %s731_s5 }
  0x19   :  { %604 = vmatpush.bf16.msra.mxu3 %v1069_v24  ;;  %159 = vst [vmem:[#allocation1 + $0x20] ss:$4 sm:$0xff] %v22_v29  ;;  %v1106_v37 = vld [vmem:[%s1481_s1 + $0x1f8] sm:$0xff]  ;;  %v1081_v38 = vld [vmem:[%s1481_s1 + $0x130] sm:$0xff]  ;;  %v1080_v46 = vld [vmem:[%s1481_s1 + $0x128] sm:$0xff]  ;;  %s729_s23 = sshll.u32 %s1227_s22, 4  ;;  %s730_s23 = int_to_ptr.vmem [resolvable:$true] %s729_s23 }
  0x1a   :  { %566 = vmatpush.bf16.msra.mxu0 %v1044_v25  ;;  %v1089_v39 = vld [vmem:[%s1481_s1 + $0x170] sm:$0xff]  ;;  %v160_v41 = vld.sshfl [vmem:[#allocation1] sm:$0xff pattern:$0x73625140]  ;;  %v1088_v47 = vld [vmem:[%s1481_s1 + $0x168] sm:$0xff] }
  0x1b   :  { %579 = vmatpush.bf16.msra.mxu1 %v1052_v26  ;;  %v162_v40 = vld.sshfl [vmem:[#allocation1 + $0x10] sm:$0xff pattern:$0x73625140]  ;;  %v163_v42 = vld.sshfl [vmem:[#allocation1 + $0x18] sm:$0xff pattern:$0x73625140] }
  0x1c   :  { %592 = vmatpush.bf16.msra.mxu2 %v1060_v27  ;;  %v161_v43 = vld.sshfl [vmem:[#allocation1 + $0x8] sm:$0xff pattern:$0x73625140]  ;;  %v1097_v44 = vld [vmem:[%s1481_s1 + $0x1b0] sm:$0xff]  ;;  %v1079_v50 = vld [vmem:[%s1481_s1 + $0x120] sm:$0xff] }
  0x1d   :  { %605 = vmatpush.bf16.msra.mxu3 %v1068_v28  ;;  %v1105_v45 = vld [vmem:[%s1481_s1 + $0x1f0] sm:$0xff]  ;;  %v1096_v48 = vld [vmem:[%s1481_s1 + $0x1a8] sm:$0xff]  ;;  %v1087_v51 = vld [vmem:[%s1481_s1 + $0x160] sm:$0xff] }
  0x1e   :  { %567 = vmatpush.bf16.msra.mxu0 %v1043_v30  ;;  %v1104_v49 = vld [vmem:[%s1481_s1 + $0x1e8] sm:$0xff]  ;;  %v1095_v52 = vld [vmem:[%s1481_s1 + $0x1a0] sm:$0xff]  ;;  %v1078_v54 = vld [vmem:[%s1481_s1 + $0x118] sm:$0xff] }
  0x1f   :  { %580 = vmatpush.bf16.msra.mxu1 %v1051_v31  ;;  %v1103_v53 = vld [vmem:[%s1481_s1 + $0x1e0] sm:$0xff]  ;;  %v1086_v55 = vld [vmem:[%s1481_s1 + $0x158] sm:$0xff]  ;;  %v1077_v58 = vld [vmem:[%s1481_s1 + $0x110] sm:$0xff] }
  0x20   :  { %593 = vmatpush.bf16.msra.mxu2 %v1059_v32  ;;  %v1094_v56 = vld [vmem:[%s1481_s1 + $0x198] sm:$0xff]  ;;  %v1085_v59 = vld [vmem:[%s1481_s1 + $0x150] sm:$0xff]  ;;  %v1076_v62 = vld [vmem:[%s1481_s1 + $0x108] sm:$0xff] }
  0x21   :  { %606 = vmatpush.bf16.msra.mxu3 %v1067_v33  ;;  %568 = vmatmul.bf16.vlgmr.msra.gmra.mxu0 %v160_v41  ;;  %v1102_v57 = vld [vmem:[%s1481_s1 + $0x1d8] sm:$0xff]  ;;  %v1093_v60 = vld [vmem:[%s1481_s1 + $0x190] sm:$0xff]  ;;  %v1084_v63 = vld [vmem:[%s1481_s1 + $0x148] sm:$0xff] }
  0x22   :  { %612 = vmatpush.bf16.msrb.mxu0 %v1082_v34  ;;  %581 = vmatmul.bf16.vlgmr.msra.gmra.mxu1 %v161_v43  ;;  %v1101_v61 = vld [vmem:[%s1481_s1 + $0x1d0] sm:$0xff]  ;;  %v1092_v0 = vld [vmem:[%s1481_s1 + $0x188] sm:$0xff]  ;;  %v1075_v2 = vld [vmem:[%s1481_s1 + $0x100] sm:$0xff] }
  0x23   :  { %625 = vmatpush.bf16.msrb.mxu1 %v1090_v35  ;;  %594 = vmatmul.bf16.vlgmr.msra.gmra.mxu2 %v162_v40  ;;  %v1100_v1 = vld [vmem:[%s1481_s1 + $0x1c8] sm:$0xff]  ;;  %v1083_v3 = vld [vmem:[%s1481_s1 + $0x140] sm:$0xff]  ;;  %v166_v8 = vld.sshfl [vmem:[#allocation1 + $0x30] sm:$0xff pattern:$0x73625140] }
  0x24   :  { %638 = vmatpush.bf16.msrb.mxu2 %v1098_v36  ;;  %607 = vmatmul.bf16.vlgmr.msra.gmra.mxu3 %v163_v42  ;;  %v1091_v4 = vld [vmem:[%s1481_s1 + $0x180] sm:$0xff]  ;;  %v165_v7 = vld.sshfl [vmem:[#allocation1 + $0x28] sm:$0xff pattern:$0x73625140] }
  0x25   :  { %651 = vmatpush.bf16.msrb.mxu3 %v1106_v37  ;;  %v1099_v5 = vld [vmem:[%s1481_s1 + $0x1c0] sm:$0xff]  ;;  %v167_v9 = vld.sshfl [vmem:[#allocation1 + $0x38] sm:$0xff pattern:$0x73625140] }
  0x26   :  { %613 = vmatpush.bf16.msrb.mxu0 %v1081_v38  ;;  %v164_v6 = vld.sshfl [vmem:[#allocation1 + $0x20] sm:$0xff pattern:$0x73625140] }
  0x27   :  { %626 = vmatpush.bf16.msrb.mxu1 %v1089_v39  ;;  %v1118_v16 = vld [vmem:[%s1482_s2] ss:$0 sm:$0xff]  ;;  %s1224_s2 = smov [#allocation4]  }
  0x28   :  { %639 = vmatpush.bf16.msrb.mxu2 %v1097_v44  ;;  %s740_s7 = sshll.u32 %s1224_s2, 4  ;;  %s741_s7 = int_to_ptr.vmem [resolvable:$true] %s740_s7 }
  0x29   :  { %652 = vmatpush.bf16.msrb.mxu3 %v1105_v45 }
  0x2a   :  { %614 = vmatpush.bf16.msrb.mxu0 %v1080_v46 }
  0x2b   :  { %627 = vmatpush.bf16.msrb.mxu1 %v1088_v47 }
  0x2c   :  { %640 = vmatpush.bf16.msrb.mxu2 %v1096_v48 }
  0x2d   :  { %653 = vmatpush.bf16.msrb.mxu3 %v1104_v49 }
  0x2e   :  { %615 = vmatpush.bf16.msrb.mxu0 %v1079_v50 }
  0x2f   :  { %628 = vmatpush.bf16.msrb.mxu1 %v1087_v51 }
  0x30   :  { %641 = vmatpush.bf16.msrb.mxu2 %v1095_v52 }
  0x31   :  { %654 = vmatpush.bf16.msrb.mxu3 %v1103_v53 }
  0x32   :  { %616 = vmatpush.bf16.msrb.mxu0 %v1078_v54 }
  0x33   :  { %629 = vmatpush.bf16.msrb.mxu1 %v1086_v55 }
  0x34   :  { %642 = vmatpush.bf16.msrb.mxu2 %v1094_v56 }
  0x35   :  { %655 = vmatpush.bf16.msrb.mxu3 %v1102_v57 }
  0x36   :  { %617 = vmatpush.bf16.msrb.mxu0 %v1077_v58 }
  0x37   :  { %630 = vmatpush.bf16.msrb.mxu1 %v1085_v59 }
  0x38   :  { %643 = vmatpush.bf16.msrb.mxu2 %v1093_v60 }
  0x39   :  { %656 = vmatpush.bf16.msrb.mxu3 %v1101_v61 }
  0x3a   :  { %618 = vmatpush.bf16.msrb.mxu0 %v1076_v62 }
  0x3b   :  { %631 = vmatpush.bf16.msrb.mxu1 %v1084_v63 }
  0x3c   :  { %644 = vmatpush.bf16.msrb.mxu2 %v1092_v0  ;;  %v1223_v0 = vmov 16.0  }
  0x3d   :  { %657 = vmatpush.bf16.msrb.mxu3 %v1100_v1  ;;  %1119 = vrcp.f32 %v1223_v0 }
  0x3e   :  { %619 = vmatpush.bf16.msrb.mxu0 %v1075_v2 }
  0x3f   :  { %632 = vmatpush.bf16.msrb.mxu1 %v1083_v3 }
  0x40   :  { %645 = vmatpush.bf16.msrb.mxu2 %v1091_v4 }
  0x41   :  { %658 = vmatpush.bf16.msrb.mxu3 %v1099_v5  ;;  %620 = vmatmul.bf16.vlgmr.msrb.gmra.mxu0 %v164_v6 }
  0x42   :  { %633 = vmatmul.bf16.vlgmr.msrb.gmra.mxu1 %v165_v7 }
  0x43   :  { %646 = vmatmul.bf16.vlgmr.msrb.gmra.mxu2 %v166_v8  ;;  %v1120_v1 = vpop.eup %1119 }
  0x44   :  { %659 = vmatmul.bf16.vlgmr.msrb.gmra.mxu3 %v167_v9  ;;  %v677_v2 = vmul.f32 16.0, %v1120_v1  ;;  %vm681_vm1 = vweird.f32 %v1120_v1 }
  0x46   :  { %v678_v3 = vsub.f32 1.0, %v677_v2 }
  0x48   :  { %v679_v4 = vmul.f32 %v1120_v1, %v678_v3 }
  0x4a   :  { %v680_v5 = vadd.f32 %v1120_v1, %v679_v4 }
  0x4c   :  { %v682_v6 = vsel %vm681_vm1, %v1120_v1, %v680_v5 }
  0x9e   :  { %v569_v10 = vpop.f32.mrf.mxu0 }
  0x9f   :  { %v582_v11 = vpop.f32.mrf.mxu1  ;;  %v570_v19 = vadd.f32 %v1118_v16, %v569_v10 }
  0xa1   :  { %v583_v20 = vadd.f32 %v582_v11, %v570_v19 }
  0xa6   :  { %v595_v12 = vpop.f32.mrf.mxu2  ;;  %v571_v14 = vpop.f32.mrf.mxu0 }
  0xa7   :  { %v608_v13 = vpop.f32.mrf.mxu3  ;;  %v584_v15 = vpop.f32.mrf.mxu1  ;;  %v596_v21 = vadd.f32 %v595_v12, %v583_v20 }
  0xa9   :  { %v609_v22 = vadd.f32 %v608_v13, %v596_v21 }
  0xae   :  { %v597_v17 = vpop.f32.mrf.mxu2 }
  0xaf   :  { %v610_v18 = vpop.f32.mrf.mxu3 }
  0xbe   :  { %v621_v23 = vpop.f32.mrf.mxu0 }
  0xbf   :  { %v634_v24 = vpop.f32.mrf.mxu1  ;;  %v622_v25 = vadd.f32 %v621_v23, %v609_v22 }
  0xc1   :  { %v635_v26 = vadd.f32 %v634_v24, %v622_v25 }
  0xc6   :  { %v647_v27 = vpop.f32.mrf.mxu2  ;;  %v623_v30 = vpop.f32.mrf.mxu0 }
  0xc7   :  { %v660_v28 = vpop.f32.mrf.mxu3  ;;  %v648_v29 = vadd.f32 %v647_v27, %v635_v26  ;;  %v636_v31 = vpop.f32.mrf.mxu1 }
  0xc9   :  { %v661_v32 = vadd.f32 %v660_v28, %v648_v29 }
  0xcb   :  { %v665_v33 = vsel %vm664_vm0, %v661_v32, 0.0  ;;  %v699_v34 = vmul.f32 0.25, %v661_v32  ;;  %v685_v39 = vrot.slane %v661_v32, 2 }
  0xcc   :  { %666 = vadd.xlane.f32.xlu0 %v665_v33 }
  0xcd   :  { %v700_v35 = vmul.f32 %v699_v34, %v661_v32  ;;  %v687_v42 = vsel %vm664_vm0, %v685_v39, 0.0 }
  0xce   :  { %v649_v36 = vpop.f32.mrf.mxu2 }
  0xcf   :  { %v662_v37 = vpop.f32.mrf.mxu3  ;;  %v701_v38 = vadd.f32 %v700_v35, %v661_v32 }
  0xd1   :  { %v703_v40 = vrot.slane %v701_v38, 2 }
  0xd3   :  { %v705_v41 = vsel %vm664_vm0, %v703_v40, 0.0 }
  0xd4   :  { %706 = vadd.xlane.f32.xlu1 %v705_v41  ;;  %688 = vadd.xlane.f32.xlu0 %v687_v42 }
 0x13f   :  { %v667_v43 = vpop.xlane.xlu0 %666 }
 0x140   :  { %v668_v44 = vrot.slane %v667_v43, 4 }
 0x142   :  { %v669_v45 = vadd.f32 %v668_v44, %v667_v43 }
 0x144   :  { %v670_v46 = vrot.slane %v669_v45, 2 }
 0x146   :  { %v671_v47 = vadd.f32 %v670_v46, %v669_v45 }
 0x147   :  { %v707_v48 = vpop.xlane.xlu1 %706  ;;  %v689_v49 = vpop.xlane.xlu0 %688 }
 0x148   :  { %v708_v50 = vrot.slane %v707_v48, 4  ;;  %v690_v51 = vrot.slane %v689_v49, 4  ;;  %v672_v52 = vrot.slane %v671_v47, 1 }
 0x14a   :  { %v709_v53 = vadd.f32 %v708_v50, %v707_v48  ;;  %v691_v54 = vadd.f32 %v690_v51, %v689_v49  ;;  %v673_v55 = vadd.f32 %v672_v52, %v671_v47 }
 0x14c   :  { %v710_v56 = vrot.slane %v709_v53, 2  ;;  %v692_v57 = vrot.slane %v691_v54, 2  ;;  %1107 = vpush %v673_v55 }
 0x14e   :  { %v711_v58 = vadd.f32 %v710_v56, %v709_v53  ;;  %v693_v59 = vadd.f32 %v692_v57, %v691_v54 }
 0x150   :  { %v694_v60 = vrot.slane %v693_v59, 1  ;;  %v712_v61 = vrot.slane %v711_v58, 1 }
 0x152   :  { %v695_v62 = vadd.f32 %v694_v60, %v693_v59  ;;  %v713_v63 = vadd.f32 %v712_v61, %v711_v58 }
 0x154   :  { %1109 = vpush %v695_v62 }
 0x155   :  { %1111 = vpush %v713_v63 }
 0x17d   :  { %s1108_s11 = spop %1107 }
 0x17e   :  { %v675_v7 = vstv %s1108_s11 }
 0x17f   :  { %v683_v8 = vmul.f32 %v682_v6, %v675_v7 }
 0x181   :  { %721 = vst.msk [vmem:[#allocation4] sm:$0x1] %vm719_vm2, %v683_v8 }
 0x182   :  { %745 = dma.vmem_to_hbm [thread:$0]  %s741_s7, 16, %s743_s10, [#allocation5]  }
 0x185   :  { %s1110_s0 = spop %1109 }
 0x186   :  { %v697_v9 = vstv %s1110_s0  ;;  %s1112_s4 = spop %1111 }
 0x187   :  { %v698_v10 = vmul.f32 %v697_v9, %v682_v6  ;;  %v715_v11 = vstv %s1112_s4 }
 0x188   :  { %v716_v12 = vmul.f32 %v715_v11, %v682_v6 }
 0x189   :  { %722 = vst.msk [vmem:[#allocation6] sm:$0x1] %vm719_vm2, %v698_v10 }
 0x18a   :  { %v717_v13 = vsub.f32 %v683_v8, %v716_v12  ;;  %756 = dma.vmem_to_hbm [thread:$0]  %s752_s13, 16, %s754_s16, [#allocation5]  }
 0x18c   :  { %723 = vst.msk [vmem:[#allocation7] sm:$0x1] %vm719_vm2, %v717_v13  ;;  %v718_v14 = vmul.f32 -1.0, %v717_v13 }
 0x18d   :  { %767 = dma.vmem_to_hbm [thread:$0]  %s763_s18, 16, %s765_s21, [#allocation8]  }
 0x18e   :  { %720 = vst.msk [vmem:[#allocation2] sm:$0x1] %vm719_vm2, %v718_v14 }
 0x18f   :  { %734 = dma.vmem_to_hbm [thread:$0]  %s730_s23, 16, %s732_s5, [#allocation3]  }
 0x190   :  { %1217 = dma.done.wait [#allocation3], 16  }
 0x191   :  { %1218 = vsyncadd [#allocation3], 4294967280 }
 0x192   :  { %1219 = dma.done.wait [#allocation5], 32  }
 0x193   :  { %1220 = vsyncadd [#allocation5], 4294967264 }
 0x194   :  { %1221 = dma.done.wait [#allocation8], 16  }
 0x195   :  { %1222 = vsyncadd [#allocation8], 4294967280 }
 0x196   :  { %784 = vsyncpa [#allocation3], 1 }
 0x197   :  { %785 = vsyncpa [#allocation5], 1 }
 0x198   :  { %786 = vsyncpa [#allocation8], 1 }

</bundles_post_ra>
